<compile_context>
chip_gen: v5e
topology: v5e:2x2
jax: 0.10.0
libtpu: 0.0.40
codegen_flags: <defaults>
</compile_context>

<pallas_src>
import jax
import jax.numpy as jnp
from jax.experimental import pallas as pl
from jax.experimental.pallas import tpu as pltpu


# ----------------------------------------------------------------------------
# Kernel
# ----------------------------------------------------------------------------
def _rule_kernel(data_ref, out_ref):
    # data_ref: (N+1, 2, TB) f32
    #   rows 0..N-1 : obs time of bot n if bot n belongs to group g, else 0
    #                 (g=0 -> lanes {2,6} / "X",  g=1 -> lanes {4,8} / "Y")
    #   row  N      : 2 * (number of bots in group g)   -- additive score term
    # out_ref : (1, TB) i32 -- 1 where X > Y, else 0 (ties -> 0, as in reference)
    t = data_ref[...]
    n = t.shape[0] - 1
    # Leading-axis reduce lowers to a chain of elementwise VPU maxes over
    # full-lane (2, TB) slabs; the clamp at 0 matches longest_time_lane's
    # 0-initialization in the reference module.
    lane_max = jnp.maximum(jnp.max(t[:n], axis=0), 0.0)       # (2, TB)
    score = lane_max + t[n]                                   # (2, TB): [X; Y]
    out_ref[...] = (score[0:1, :] > score[1:2, :]).astype(jnp.int32)


# ----------------------------------------------------------------------------
# Wrapper
# ----------------------------------------------------------------------------
def _pick_batch_tile(batch, bytes_per_col):
    """Largest lane-aligned batch tile: few grid steps, VMEM-safe on all chips."""
    # Tightest default scoped-VMEM budget is v5e's 16 MiB.  Keep the 2-deep
    # double-buffered input block (+ output) comfortably under it: ~6 MiB per
    # in-flight input block.
    cap = max(128, ((6 << 20) // max(bytes_per_col, 1)) // 128 * 128)
    if batch <= 256 or batch % 128 != 0:
        return batch, 1                       # single full-extent block
    tb = min(batch, cap)
    if tb >= batch:
        # Force >= 2 grid steps so the "parallel" axis uses both v7x TCs.
        tb = max(128, (batch // 2 // 128) * 128)
    return tb, pl.cdiv(batch, tb)


def rule_based_forward(packed):
    """packed: (N+1, 2, B) float32 (see _dicts_to_arrays).
    Returns int32 (B, 4); row b is RuleBasedModel.forward for problem b."""
    rows, g, batch = packed.shape
    assert g == 2 and rows >= 2

    bytes_per_col = rows * 2 * 4 + 4          # input + output bytes per batch column
    tb, steps = _pick_batch_tile(batch, bytes_per_col)

    decision = pl.pallas_call(
        _rule_kernel,
        out_shape=jax.ShapeDtypeStruct((1, batch), jnp.int32),
        grid=(steps,),
        in_specs=[pl.BlockSpec((rows, 2, tb), lambda i: (0, 0, i))],
        out_specs=pl.BlockSpec((1, tb), lambda i: (0, i)),
        compiler_params=pltpu.CompilerParams(
            # Shards the batch across the 2 TensorCores on v7x when steps >= 2;
            # measured no-op (and harmless) on single-TC v5e/v6e.
            dimension_semantics=("parallel",)),
    )(packed)

    d = decision[0]                           # (B,) int32, 1 iff X > Y
    # Parity expansion in plain XLA (kernel output stays lane-dense):
    #   X > Y -> [1,0,1,0] ; X <= Y (incl. tie) -> [0,1,0,1]
    return jnp.stack([d, 1 - d, d, 1 - d], axis=-1).astype(jnp.int32)


# ----------------------------------------------------------------------------
# Host-side glue: lower the dict inputs of the PyTorch module to a dense array.
# ----------------------------------------------------------------------------
_GROUP_OF_LANE = {2: 0, 6: 0, 4: 1, 8: 1}


def _dicts_to_arrays(problems, num_bots):
    """problems: list of (lane_bots, bots_obs_times) pairs.
    Returns one packed float32 array of shape (num_bots + 1, 2, B):
      [n, g, b], n < num_bots : obs time of bot n if it belongs to group g, else 0
      [num_bots, g, b]        : 2 * |group g|  (the additive score term)
    NOTE: zero-filling non-member slots is only safe because the kernel clamps
    the lane max at >= 0 (matching the reference's longest_time_lane = 0 init).
    """
    batch = len(problems)
    packed = [[[0.0] * batch for _ in range(2)] for _ in range(num_bots + 1)]
    for b, (lane_bots, obs_times) in enumerate(problems):
        for lane_id, bot_ids in lane_bots.items():
            grp = _GROUP_OF_LANE[lane_id]
            packed[num_bots][grp][b] += 2.0 * len(bot_ids)
            for bot_id in bot_ids:
                packed[bot_id][grp][b] = float(obs_times[bot_id])
    return jnp.asarray(packed, jnp.float32)


def _reference_forward(lane_bots, bots_obs_times):
    """Pure-Python transcription of the PyTorch forward (for verification)."""
    longest = {2: 0, 4: 0, 6: 0, 8: 0}
    for lane_id, bot_ids in lane_bots.items():
        for bot_id in bot_ids:
            if bots_obs_times[bot_id] > longest[lane_id]:
                longest[lane_id] = bots_obs_times[bot_id]
    lt = [longest[2], longest[4], longest[6], longest[8]]
    ln = [len(lane_bots[2]), len(lane_bots[4]), len(lane_bots[6]), len(lane_bots[8])]
    x = max(lt[0], lt[2]) + 2 * (ln[0] + ln[2])
    y = max(lt[1], lt[3]) + 2 * (ln[1] + ln[3])
    return [1, 0, 1, 0] if x > y else [0, 1, 0, 1]


if __name__ == "__main__":
    num_bots = 8
    lane_layouts = [
        {2: [0, 1], 4: [2], 6: [3, 4, 5], 8: [6, 7]},
        {2: [0], 4: [1, 2, 3], 6: [4], 8: [5, 6, 7]},
        {2: [0, 1, 2, 3], 4: [4], 6: [5, 6], 8: [7]},
        {2: [], 4: [0, 1], 6: [2, 3], 8: [4, 5, 6, 7]},
        {2: [], 4: [], 6: [], 8: []},          # exercises the X == Y tie path
    ]

    key = jax.random.PRNGKey(0)
    keys = jax.random.split(key, len(lane_layouts))
    problems = []
    for kb, lane_bots in zip(keys, lane_layouts):
        times = jax.random.uniform(kb, (num_bots,), jnp.float32, 0.0, 10.0)
        bots_obs_times = {b: float(times[b]) for b in range(num_bots)}
        problems.append((lane_bots, bots_obs_times))

    packed = _dicts_to_arrays(problems, num_bots)        # (9, 2, 5) f32
    colors = jax.block_until_ready(rule_based_forward(packed))

    assert colors.dtype == jnp.int32 and colors.shape == (len(problems), 4)
    for b, (lane_bots, bots_obs_times) in enumerate(problems):
        ref = _reference_forward(lane_bots, bots_obs_times)
        got = [int(v) for v in colors[b]]
        assert got == ref, (b, got, ref)
    print("KERNEL_OK")
</pallas_src>

<mosaic_0001>
module attributes {stable_mosaic.version = 11 : i64} {
  func.func @_rule_kernel(%arg0: i32, %arg1: memref<9x2x5xf32, #tpu.memory_space<vmem>>, %arg2: memref<1x5xi32, #tpu.memory_space<vmem>>) attributes {dimension_semantics = [#tpu.dimension_semantics<parallel>], iteration_bounds = array<i64: 1>, scalar_prefetch = 0 : i64, scratch_operands = 0 : i64, tpu.core_type = #tpu.core_type<tc>, window_params = [{transform_indices = @transform_0, window_bounds = array<i64: 9, 2, 5>}, {transform_indices = @transform_1, window_bounds = array<i64: 1, 5>}]} {
    %c0 = arith.constant 0 : index
    %c0_0 = arith.constant 0 : index
    %c0_1 = arith.constant 0 : index
    %0 = vector.load %arg1[%c0, %c0_0, %c0_1] : memref<9x2x5xf32, #tpu.memory_space<vmem>>, vector<9x2x5xf32>
    %1 = vector.extract_strided_slice %0 {offsets = [0, 0, 0], sizes = [8, 2, 5], strides = [1, 1, 1]} : vector<9x2x5xf32> to vector<8x2x5xf32>
    %cst = arith.constant dense<0xFF800000> : vector<2x5xf32>
    %2 = vector.multi_reduction <maximumf>, %1, %cst [0] : vector<8x2x5xf32> to vector<2x5xf32>
    %cst_2 = arith.constant 0.000000e+00 : f32
    %3 = vector.broadcast %cst_2 : f32 to vector<2x5xf32>
    %4 = arith.maximumf %2, %3 : vector<2x5xf32>
    %5 = vector.extract_strided_slice %0 {offsets = [8, 0, 0], sizes = [1, 2, 5], strides = [1, 1, 1]} : vector<9x2x5xf32> to vector<1x2x5xf32>
    %6 = vector.shape_cast %5 : vector<1x2x5xf32> to vector<2x5xf32>
    %7 = arith.addf %4, %6 : vector<2x5xf32>
    %8 = vector.extract_strided_slice %7 {offsets = [0, 0], sizes = [1, 5], strides = [1, 1]} : vector<2x5xf32> to vector<1x5xf32>
    %9 = vector.extract_strided_slice %7 {offsets = [1, 0], sizes = [1, 5], strides = [1, 1]} : vector<2x5xf32> to vector<1x5xf32>
    %10 = arith.cmpf ogt, %8, %9 : vector<1x5xf32>
    %11 = arith.extui %10 : vector<1x5xi1> to vector<1x5xi32>
    %c0_3 = arith.constant 0 : index
    %c0_4 = arith.constant 0 : index
    %12 = vector.load %arg2[%c0_3, %c0_4] : memref<1x5xi32, #tpu.memory_space<vmem>>, vector<1x5xi32>
    tpu.vector_store %arg2[%c0_3, %c0_4], %11 {strides = array<i32>} : memref<1x5xi32, #tpu.memory_space<vmem>>, vector<1x5xi32>,
    return
  }
  func.func @transform_0(%arg0: i32) -> (i32, i32, i32) {
    %c0_i32 = arith.constant 0 : i32
    %c0_i32_0 = arith.constant 0 : i32
    %c0_i32_1 = arith.constant 0 : i32
    return %c0_i32, %c0_i32_0, %arg0 : i32, i32, i32
  }
  func.func @transform_1(%arg0: i32) -> (i32, i32) {
    %c0_i32 = arith.constant 0 : i32
    %c0_i32_0 = arith.constant 0 : i32
    return %c0_i32, %arg0 : i32, i32
  }
}

</mosaic_0001>

<bundles_post_ra>
// kernel: tpu_custom_call.1
= control target key start
LH: loop header
LB: loop body
LE: loop exit
PB: predicated region body
PF: predicated region fallthrough
CT: control target
= control target key end

     0   :  { %vm18_vm0 = vcmask 33792   ;;  %s129_s0 = inlined_call_operand.vmem [shape: f32[9,2,5], index: 0, kind: input, shape index: {}]   ;;  %s130_s1 = inlined_call_operand.hbm [shape: s32[1,5], index: 1, kind: output, shape index: {}]  }
   0x1   :  { %v9_v0 = vld [vmem:[%s129_s0] sm:$0x3]  ;;  %v10_v1 = vld [vmem:[%s129_s0 + $0x2] sm:$0x3]  ;;  %v11_v2 = vld [vmem:[%s129_s0 + $0x4] sm:$0x3] }
   0x2   :  { %v12_v3 = vld [vmem:[%s129_s0 + $0x6] sm:$0x3]  ;;  %v13_v4 = vld [vmem:[%s129_s0 + $0x8] sm:$0x3]  ;;  %v14_v5 = vld [vmem:[%s129_s0 + $0xa] sm:$0x3] }
   0x3   :  { %v15_v6 = vld [vmem:[%s129_s0 + $0xc] sm:$0x3]  ;;  %v16_v7 = vld [vmem:[%s129_s0 + $0xe] sm:$0x3] }
   0x4   :  { %6 = vsyncpa [#allocation3], 0  ;;  %v19_v8 = vsel %vm18_vm0, %v9_v0, -inf  ;;  %v20_v9 = vsel %vm18_vm0, %v10_v1, -inf  ;;  %v21_v10 = vsel %vm18_vm0, %v11_v2, -inf  ;;  %v22_v11 = vsel %vm18_vm0, %v12_v3, -inf }
   0x5   :  { %v23_v12 = vsel %vm18_vm0, %v13_v4, -inf  ;;  %v25_v13 = vsel %vm18_vm0, %v14_v5, -inf  ;;  %v27_v14 = vsel %vm18_vm0, %v15_v6, -inf  ;;  %v29_v15 = vsel %vm18_vm0, %v16_v7, -inf  ;;  %v17_v23 = vld [vmem:[%s129_s0 + $0x10] sm:$0x3] }
   0x6   :  { %v24_v16 = vmax.f32 %v19_v8, %v23_v12  ;;  %v26_v17 = vmax.f32 %v20_v9, %v25_v13  ;;  %v28_v18 = vmax.f32 %v21_v10, %v27_v14  ;;  %v30_v19 = vmax.f32 %v22_v11, %v29_v15  ;;  %s87_s24 = smov [#allocation2]   ;;  %s50_s28 = sshll.u32 %s130_s1, 4  ;;  %s51_s28 = int_to_ptr.hbm [resolvable:$true] %s50_s28 }
   0x7   :  { %s48_s25 = sshll.u32 %s87_s24, 4  ;;  %vm41_vm1 = vcmask 32768   ;;  %v88_v27 = vmov 0   ;;  %s49_s25 = int_to_ptr.vmem [resolvable:$true] %s48_s25 }
   0x8   :  { %v31_v20 = vmax.f32 %v24_v16, %v26_v17  ;;  %v32_v21 = vmax.f32 %v28_v18, %v30_v19 }
   0xa   :  { %v33_v22 = vmax.f32 %v31_v20, %v32_v21 }
   0xc   :  { %v34_v24 = vmax.f32 %v33_v22, 0.0 }
   0xe   :  { %v35_v25 = vadd.f32 %v34_v24, %v17_v23 }
  0x10   :  { %v37_v26 = vrot.slane %v35_v25, 1 }
  0x12   :  { %vm39_vm2 = vcmp.gt.f32.partialorder %v35_v25, %v37_v26 }
  0x13   :  { %v40_v28 = vsel %vm39_vm2, 1, %v88_v27 }
  0x14   :  { %42 = vst.msk [vmem:[#allocation2] sm:$0x1] %vm41_vm1, %v40_v28 }
  0x15   :  { %53 = dma.vmem_to_hbm [thread:$0]  %s49_s25, 16, %s51_s28, [#allocation3]  }
  0x16   :  { %85 = dma.done.wait [#allocation3], 16  }
  0x17   :  { %86 = vsyncadd [#allocation3], 4294967280 }
  0x18   :  { %58 = vsyncpa [#allocation3], 1 }

</bundles_post_ra>
